<compile_context>
chip_gen: v7x
topology: tpu7x:2x2x1
jax: 0.10.0
libtpu: 0.0.40
codegen_flags: <defaults>
</compile_context>

<pallas_src>
import functools

import jax
import jax.numpy as jnp
from jax.experimental import pallas as pl
from jax.experimental.pallas import tpu as pltpu

hidden_size = 128
input_size = 50 * 2   # 100
output_size = 2

LANE = 128
SUBLANE = 8


def _round_up(x, m):
    return ((x + m - 1) // m) * m


def mlp_kernel(x_ref,
               w1_ref, b1_ref,
               w2_ref, b2_ref,
               w3_ref, b3_ref,
               w4_ref, b4_ref,
               o_ref):
    # Four fused matmuls on the MXU (f32 accumulation); bias-add + ReLU on the
    # VPU in f32, then cast back to the operand dtype for the next dot.
    op_dtype = w1_ref.dtype

    h = jnp.dot(x_ref[...], w1_ref[...], preferred_element_type=jnp.float32)
    h = jnp.maximum(h + b1_ref[...], 0.0).astype(op_dtype)

    h = jnp.dot(h, w2_ref[...], preferred_element_type=jnp.float32)
    h = jnp.maximum(h + b2_ref[...], 0.0).astype(op_dtype)

    h = jnp.dot(h, w3_ref[...], preferred_element_type=jnp.float32)
    h = jnp.maximum(h + b3_ref[...], 0.0).astype(op_dtype)

    out = jnp.dot(h, w4_ref[...], preferred_element_type=jnp.float32) + b4_ref[...]
    o_ref[...] = out.astype(o_ref.dtype)


@functools.partial(jax.jit, static_argnames=("compute_dtype", "tile_b_max"))
def mlp_forward(x, params, *, compute_dtype=jnp.float32, tile_b_max=1024):
    """x: (B, input_size) f32. params: ((w1,b1),...,(w4,b4)) with w as (in,out),
    b as (1,out). Returns (B, output_size) f32."""
    (w1, b1), (w2, b2), (w3, b3), (w4, b4) = params
    B, K = x.shape
    H = w1.shape[1]
    N_out = w4.shape[1]

    # Lane-aligned padded sizes.
    K_pad = _round_up(K, LANE)        # 100 -> 128
    N_pad = _round_up(N_out, LANE)    # 2   -> 128

    # Batch tile: biggest aligned tile up to tile_b_max (budgeted for 64 MiB
    # VMEM on v7x: 2-deep x buffer + 2-deep out buffer + ~320 KB weights).
    tile_b = min(tile_b_max, _round_up(B, SUBLANE))
    B_pad = _round_up(B, tile_b)

    # Zero-pad activations / weights to aligned shapes (zeros are inert).
    x_p = jnp.pad(x, ((0, B_pad - B), (0, K_pad - K))).astype(compute_dtype)
    w1_p = jnp.pad(w1, ((0, K_pad - K), (0, 0))).astype(compute_dtype)
    w2_p = w2.astype(compute_dtype)
    w3_p = w3.astype(compute_dtype)
    w4_p = jnp.pad(w4, ((0, 0), (0, N_pad - N_out))).astype(compute_dtype)
    b4_p = jnp.pad(b4, ((0, 0), (0, N_pad - N_out)))   # biases stay f32

    grid = (B_pad // tile_b,)

    out = pl.pallas_call(
        mlp_kernel,
        out_shape=jax.ShapeDtypeStruct((B_pad, N_pad), jnp.float32),
        grid=grid,
        in_specs=[
            pl.BlockSpec((tile_b, K_pad), lambda i: (i, 0)),   # x: tiled on batch
            pl.BlockSpec((K_pad, H), lambda i: (0, 0)),        # w1: resident
            pl.BlockSpec((1, H), lambda i: (0, 0)),            # b1
            pl.BlockSpec((H, H), lambda i: (0, 0)),            # w2
            pl.BlockSpec((1, H), lambda i: (0, 0)),            # b2
            pl.BlockSpec((H, H), lambda i: (0, 0)),            # w3
            pl.BlockSpec((1, H), lambda i: (0, 0)),            # b3
            pl.BlockSpec((H, N_pad), lambda i: (0, 0)),        # w4 (padded out)
            pl.BlockSpec((1, N_pad), lambda i: (0, 0)),        # b4 (padded out)
        ],
        out_specs=pl.BlockSpec((tile_b, N_pad), lambda i: (i, 0)),
        compiler_params=pltpu.CompilerParams(
            dimension_semantics=("parallel",),   # megacore sharding on v7x
            vmem_limit_bytes=32 << 20,
        ),
    )(x_p, w1_p, b1, w2_p, b2, w3_p, b3, w4_p, b4_p)

    # Strip batch + lane padding back to the logical output shape.
    return out[:B, :N_out]


def init_linear(key, fan_in, fan_out):
    # Mimic PyTorch nn.Linear default init: U(-1/sqrt(fan_in), 1/sqrt(fan_in)).
    kw, kb = jax.random.split(key)
    bound = 1.0 / jnp.sqrt(jnp.float32(fan_in))
    # weight stored as (in, out) so the kernel does x @ w directly.
    w = jax.random.uniform(kw, (fan_in, fan_out), jnp.float32, -bound, bound)
    b = jax.random.uniform(kb, (1, fan_out), jnp.float32, -bound, bound)
    return w, b


def reference_forward(x, params):
    (w1, b1), (w2, b2), (w3, b3), (w4, b4) = params
    h = jnp.maximum(x @ w1 + b1, 0.0)
    h = jnp.maximum(h @ w2 + b2, 0.0)
    h = jnp.maximum(h @ w3 + b3, 0.0)
    return h @ w4 + b4


if __name__ == "__main__":
    key = jax.random.PRNGKey(0)
    kx, k1, k2, k3, k4, kx2 = jax.random.split(key, 6)

    params = (
        init_linear(k1, input_size, hidden_size),
        init_linear(k2, hidden_size, hidden_size),
        init_linear(k3, hidden_size, hidden_size),
        init_linear(k4, hidden_size, output_size),
    )

    # 1) Small batch (matches the original usage), f32 — exact semantics.
    batch = 8
    x = jax.random.normal(kx, (batch, input_size), jnp.float32)
    out = jax.block_until_ready(mlp_forward(x, params))
    ref = reference_forward(x, params)
    assert out.shape == (batch, output_size)
    assert jnp.allclose(out, ref, atol=1e-4, rtol=1e-4), "f32 mismatch vs reference"

    # 2) Larger batch exercising the batch grid (grid > 1, padded batch), f32.
    batch2 = 1000
    x2 = jax.random.normal(kx2, (batch2, input_size), jnp.float32)
    out2 = jax.block_until_ready(mlp_forward(x2, params, tile_b_max=256))
    ref2 = reference_forward(x2, params)
    assert out2.shape == (batch2, output_size)
    assert jnp.allclose(out2, ref2, atol=1e-4, rtol=1e-4), "tiled f32 mismatch"

    # 3) bf16 MXU path (f32 accumulation) — looser tolerance.
    out_bf16 = jax.block_until_ready(
        mlp_forward(x2, params, compute_dtype=jnp.bfloat16, tile_b_max=256))
    assert jnp.allclose(out_bf16, ref2, atol=1e-1, rtol=1e-1), "bf16 mismatch"

    print("KERNEL_OK")
</pallas_src>

<mosaic_0001>
module attributes {stable_mosaic.version = 11 : i64} {
  func.func @mlp_kernel(%arg0: i32, %arg1: memref<8x128xf32, #tpu.memory_space<vmem>>, %arg2: memref<128x128xf32, #tpu.memory_space<vmem>>, %arg3: memref<1x128xf32, #tpu.memory_space<vmem>>, %arg4: memref<128x128xf32, #tpu.memory_space<vmem>>, %arg5: memref<1x128xf32, #tpu.memory_space<vmem>>, %arg6: memref<128x128xf32, #tpu.memory_space<vmem>>, %arg7: memref<1x128xf32, #tpu.memory_space<vmem>>, %arg8: memref<128x128xf32, #tpu.memory_space<vmem>>, %arg9: memref<1x128xf32, #tpu.memory_space<vmem>>, %arg10: memref<8x128xf32, #tpu.memory_space<vmem>>) attributes {dimension_semantics = [#tpu.dimension_semantics<parallel>], iteration_bounds = array<i64: 1>, scalar_prefetch = 0 : i64, scratch_operands = 0 : i64, tpu.core_type = #tpu.core_type<tc>, window_params = [{transform_indices = @transform_0, window_bounds = array<i64: 8, 128>}, {pipeline_mode = #tpu.pipeline_mode<synchronous>, transform_indices = @transform_1, window_bounds = array<i64: 128, 128>}, {pipeline_mode = #tpu.pipeline_mode<synchronous>, transform_indices = @transform_2, window_bounds = array<i64: 1, 128>}, {pipeline_mode = #tpu.pipeline_mode<synchronous>, transform_indices = @transform_3, window_bounds = array<i64: 128, 128>}, {pipeline_mode = #tpu.pipeline_mode<synchronous>, transform_indices = @transform_4, window_bounds = array<i64: 1, 128>}, {pipeline_mode = #tpu.pipeline_mode<synchronous>, transform_indices = @transform_5, window_bounds = array<i64: 128, 128>}, {pipeline_mode = #tpu.pipeline_mode<synchronous>, transform_indices = @transform_6, window_bounds = array<i64: 1, 128>}, {pipeline_mode = #tpu.pipeline_mode<synchronous>, transform_indices = @transform_7, window_bounds = array<i64: 128, 128>}, {pipeline_mode = #tpu.pipeline_mode<synchronous>, transform_indices = @transform_8, window_bounds = array<i64: 1, 128>}, {transform_indices = @transform_9, window_bounds = array<i64: 8, 128>}]} {
    %c0 = arith.constant 0 : index
    %c0_0 = arith.constant 0 : index
    %0 = vector.load %arg1[%c0, %c0_0] : memref<8x128xf32, #tpu.memory_space<vmem>>, vector<8x128xf32>
    %c0_1 = arith.constant 0 : index
    %c0_2 = arith.constant 0 : index
    %1 = vector.load %arg2[%c0_1, %c0_2] : memref<128x128xf32, #tpu.memory_space<vmem>>, vector<128x128xf32>
    %cst = arith.constant dense<0.000000e+00> : vector<8x128xf32>
    %2 = tpu.matmul %0, %1, %cst {dimension_numbers = #tpu.dot_dimension_numbers<[1], [0], [0], [1], [0, 0, 1, 1], [], []>} : vector<8x128xf32>, vector<128x128xf32>, vector<8x128xf32> -> vector<8x128xf32>
    %c0_3 = arith.constant 0 : index
    %c0_4 = arith.constant 0 : index
    %3 = vector.load %arg3[%c0_3, %c0_4] : memref<1x128xf32, #tpu.memory_space<vmem>>, vector<1x128xf32>
    %4 = vector.broadcast %3 : vector<1x128xf32> to vector<8x128xf32>
    %5 = arith.addf %2, %4 : vector<8x128xf32>
    %cst_5 = arith.constant 0.000000e+00 : f32
    %6 = vector.broadcast %cst_5 : f32 to vector<8x128xf32>
    %7 = arith.maximumf %5, %6 : vector<8x128xf32>
    %c0_6 = arith.constant 0 : index
    %c0_7 = arith.constant 0 : index
    %8 = vector.load %arg4[%c0_6, %c0_7] : memref<128x128xf32, #tpu.memory_space<vmem>>, vector<128x128xf32>
    %cst_8 = arith.constant dense<0.000000e+00> : vector<8x128xf32>
    %9 = tpu.matmul %7, %8, %cst_8 {dimension_numbers = #tpu.dot_dimension_numbers<[1], [0], [0], [1], [0, 0, 1, 1], [], []>} : vector<8x128xf32>, vector<128x128xf32>, vector<8x128xf32> -> vector<8x128xf32>
    %c0_9 = arith.constant 0 : index
    %c0_10 = arith.constant 0 : index
    %10 = vector.load %arg5[%c0_9, %c0_10] : memref<1x128xf32, #tpu.memory_space<vmem>>, vector<1x128xf32>
    %11 = vector.broadcast %10 : vector<1x128xf32> to vector<8x128xf32>
    %12 = arith.addf %9, %11 : vector<8x128xf32>
    %cst_11 = arith.constant 0.000000e+00 : f32
    %13 = vector.broadcast %cst_11 : f32 to vector<8x128xf32>
    %14 = arith.maximumf %12, %13 : vector<8x128xf32>
    %c0_12 = arith.constant 0 : index
    %c0_13 = arith.constant 0 : index
    %15 = vector.load %arg6[%c0_12, %c0_13] : memref<128x128xf32, #tpu.memory_space<vmem>>, vector<128x128xf32>
    %cst_14 = arith.constant dense<0.000000e+00> : vector<8x128xf32>
    %16 = tpu.matmul %14, %15, %cst_14 {dimension_numbers = #tpu.dot_dimension_numbers<[1], [0], [0], [1], [0, 0, 1, 1], [], []>} : vector<8x128xf32>, vector<128x128xf32>, vector<8x128xf32> -> vector<8x128xf32>
    %c0_15 = arith.constant 0 : index
    %c0_16 = arith.constant 0 : index
    %17 = vector.load %arg7[%c0_15, %c0_16] : memref<1x128xf32, #tpu.memory_space<vmem>>, vector<1x128xf32>
    %18 = vector.broadcast %17 : vector<1x128xf32> to vector<8x128xf32>
    %19 = arith.addf %16, %18 : vector<8x128xf32>
    %cst_17 = arith.constant 0.000000e+00 : f32
    %20 = vector.broadcast %cst_17 : f32 to vector<8x128xf32>
    %21 = arith.maximumf %19, %20 : vector<8x128xf32>
    %c0_18 = arith.constant 0 : index
    %c0_19 = arith.constant 0 : index
    %22 = vector.load %arg8[%c0_18, %c0_19] : memref<128x128xf32, #tpu.memory_space<vmem>>, vector<128x128xf32>
    %cst_20 = arith.constant dense<0.000000e+00> : vector<8x128xf32>
    %23 = tpu.matmul %21, %22, %cst_20 {dimension_numbers = #tpu.dot_dimension_numbers<[1], [0], [0], [1], [0, 0, 1, 1], [], []>} : vector<8x128xf32>, vector<128x128xf32>, vector<8x128xf32> -> vector<8x128xf32>
    %c0_21 = arith.constant 0 : index
    %c0_22 = arith.constant 0 : index
    %24 = vector.load %arg9[%c0_21, %c0_22] : memref<1x128xf32, #tpu.memory_space<vmem>>, vector<1x128xf32>
    %25 = vector.broadcast %24 : vector<1x128xf32> to vector<8x128xf32>
    %26 = arith.addf %23, %25 : vector<8x128xf32>
    %c0_23 = arith.constant 0 : index
    %c0_24 = arith.constant 0 : index
    %27 = vector.load %arg10[%c0_23, %c0_24] : memref<8x128xf32, #tpu.memory_space<vmem>>, vector<8x128xf32>
    tpu.vector_store %arg10[%c0_23, %c0_24], %26 {strides = array<i32>} : memref<8x128xf32, #tpu.memory_space<vmem>>, vector<8x128xf32>,
    return
  }
  func.func @transform_0(%arg0: i32) -> (i32, i32) {
    %c0_i32 = arith.constant 0 : i32
    %c0_i32_0 = arith.constant 0 : i32
    return %arg0, %c0_i32 : i32, i32
  }
  func.func @transform_1(%arg0: i32) -> (i32, i32) {
    %c0_i32 = arith.constant 0 : i32
    %c0_i32_0 = arith.constant 0 : i32
    %c0_i32_1 = arith.constant 0 : i32
    return %c0_i32, %c0_i32_0 : i32, i32
  }
  func.func @transform_2(%arg0: i32) -> (i32, i32) {
    %c0_i32 = arith.constant 0 : i32
    %c0_i32_0 = arith.constant 0 : i32
    %c0_i32_1 = arith.constant 0 : i32
    return %c0_i32, %c0_i32_0 : i32, i32
  }
  func.func @transform_3(%arg0: i32) -> (i32, i32) {
    %c0_i32 = arith.constant 0 : i32
    %c0_i32_0 = arith.constant 0 : i32
    %c0_i32_1 = arith.constant 0 : i32
    return %c0_i32, %c0_i32_0 : i32, i32
  }
  func.func @transform_4(%arg0: i32) -> (i32, i32) {
    %c0_i32 = arith.constant 0 : i32
    %c0_i32_0 = arith.constant 0 : i32
    %c0_i32_1 = arith.constant 0 : i32
    return %c0_i32, %c0_i32_0 : i32, i32
  }
  func.func @transform_5(%arg0: i32) -> (i32, i32) {
    %c0_i32 = arith.constant 0 : i32
    %c0_i32_0 = arith.constant 0 : i32
    %c0_i32_1 = arith.constant 0 : i32
    return %c0_i32, %c0_i32_0 : i32, i32
  }
  func.func @transform_6(%arg0: i32) -> (i32, i32) {
    %c0_i32 = arith.constant 0 : i32
    %c0_i32_0 = arith.constant 0 : i32
    %c0_i32_1 = arith.constant 0 : i32
    return %c0_i32, %c0_i32_0 : i32, i32
  }
  func.func @transform_7(%arg0: i32) -> (i32, i32) {
    %c0_i32 = arith.constant 0 : i32
    %c0_i32_0 = arith.constant 0 : i32
    %c0_i32_1 = arith.constant 0 : i32
    return %c0_i32, %c0_i32_0 : i32, i32
  }
  func.func @transform_8(%arg0: i32) -> (i32, i32) {
    %c0_i32 = arith.constant 0 : i32
    %c0_i32_0 = arith.constant 0 : i32
    %c0_i32_1 = arith.constant 0 : i32
    return %c0_i32, %c0_i32_0 : i32, i32
  }
  func.func @transform_9(%arg0: i32) -> (i32, i32) {
    %c0_i32 = arith.constant 0 : i32
    %c0_i32_0 = arith.constant 0 : i32
    return %arg0, %c0_i32 : i32, i32
  }
}

</mosaic_0001>

<bundles_post_ra>
// kernel: mlp_forward.1
= control target key start
LH: loop header
LB: loop body
LE: loop exit
PB: predicated region body
PF: predicated region fallthrough
CT: control target
= control target key end

     0   :  { %v724_v0 = vmov 0.0|0.0   ;;  %vm725_vm0 = vmmov 0   ;;  %v726_v4 = vmov 0.0   ;;  %s1027_s1 = inlined_call_operand.vmem [shape: f32[128,128], index: 1, kind: input, shape index: {}]   ;;  %s1028_s3 = inlined_call_operand.vmem [shape: f32[128,128], index: 3, kind: input, shape index: {}]   ;;  %s1029_s0 = inlined_call_operand.vmem [shape: f32[8,128], index: 0, kind: input, shape index: {}]   ;;  %s1030_s5 = inlined_call_operand.vmem [shape: f32[128,128], index: 5, kind: input, shape index: {}]   ;;  %s1031_s2 = inlined_call_operand.vmem [shape: f32[1,128], index: 2, kind: input, shape index: {}]   ;;  %s1032_s7 = inlined_call_operand.vmem [shape: f32[128,128], index: 7, kind: input, shape index: {}]   ;;  %s1033_s4 = inlined_call_operand.vmem [shape: f32[1,128], index: 4, kind: input, shape index: {}]   ;;  %s1034_s6 = inlined_call_operand.vmem [shape: f32[1,128], index: 6, kind: input, shape index: {}]   ;;  %s1035_s8 = inlined_call_operand.vmem [shape: f32[1,128], index: 8, kind: input, shape index: {}]   ;;  %s1036_s9 = inlined_call_operand.vmem [shape: f32[8,128], index: 9, kind: output, shape index: {}]  }
   0x1   :  { %625 = vmatprep.subr.bf16.mxu0 %v724_v0  ;;  %v33_v1 = vld [vmem:[%s1027_s1] sm:$0xff]  ;;  %v34_v2 = vld [vmem:[%s1027_s1 + $0x8] sm:$0xff]  ;;  %v35_v3 = vld [vmem:[%s1027_s1 + $0x10] sm:$0xff]  ;;  %517 = vmatprep.mubr.msk.f32.mxu0 %vm725_vm0, %v726_v4 }
   0x2   :  { %v626_v5 = vpack.c.bf16 %v34_v2, %v33_v1  ;;  %v36_v6 = vld [vmem:[%s1027_s1 + $0x18] sm:$0xff]  ;;  %649 = vmatprep.subr.bf16.mxu1 %v724_v0  ;;  %552 = vmatprep.mubr.msk.f32.mxu1 %vm725_vm0, %v726_v4  ;;  %v37_v8 = vld [vmem:[%s1027_s1 + $0x20] sm:$0xff]  ;;  %v38_v9 = vld [vmem:[%s1027_s1 + $0x28] sm:$0xff] }
   0x3   :  { %v629_v7 = vpack.c.bf16 %v36_v6, %v35_v3  ;;  %v127_v10 = vld [vmem:[%s1028_s3] sm:$0xff]  ;;  %v128_v11 = vld [vmem:[%s1028_s3 + $0x8] sm:$0xff]  ;;  %v129_v12 = vld [vmem:[%s1028_s3 + $0x10] sm:$0xff]  ;;  %v632_v14 = vpack.c.bf16 %v38_v9, %v37_v8 }
   0x4   :  { %627 = vmatpush3.bf16.msra.mxu0 %v626_v5  ;;  %v130_v13 = vld [vmem:[%s1028_s3 + $0x18] sm:$0xff]  ;;  %v650_v15 = vpack.c.bf16 %v128_v11, %v127_v10  ;;  %v39_v16 = vld [vmem:[%s1027_s1 + $0x30] sm:$0xff]  ;;  %v131_v19 = vld [vmem:[%s1028_s3 + $0x20] sm:$0xff] }
   0x5   :  { %628 = vmatprep.subr.bf16.mxu0 %v724_v0  ;;  %v40_v17 = vld [vmem:[%s1027_s1 + $0x38] sm:$0xff]  ;;  %v653_v18 = vpack.c.bf16 %v130_v13, %v129_v12  ;;  %v132_v20 = vld [vmem:[%s1028_s3 + $0x28] sm:$0xff]  ;;  %v41_v22 = vld [vmem:[%s1027_s1 + $0x40] sm:$0xff] }
   0x6   :  { %651 = vmatpush3.bf16.msra.mxu1 %v650_v15  ;;  %v635_v21 = vpack.c.bf16 %v40_v17, %v39_v16  ;;  %v42_v23 = vld [vmem:[%s1027_s1 + $0x48] sm:$0xff]  ;;  %v656_v24 = vpack.c.bf16 %v132_v20, %v131_v19  ;;  %v133_v25 = vld [vmem:[%s1028_s3 + $0x30] sm:$0xff]  ;;  %v134_v26 = vld [vmem:[%s1028_s3 + $0x38] sm:$0xff] }
   0x7   :  { %652 = vmatprep.subr.bf16.mxu1 %v724_v0  ;;  %v638_v27 = vpack.c.bf16 %v42_v23, %v41_v22  ;;  %v43_v28 = vld [vmem:[%s1027_s1 + $0x50] sm:$0xff]  ;;  %v44_v29 = vld [vmem:[%s1027_s1 + $0x58] sm:$0xff]  ;;  %v659_v30 = vpack.c.bf16 %v134_v26, %v133_v25  ;;  %v135_v31 = vld [vmem:[%s1028_s3 + $0x40] sm:$0xff] }
   0x8   :  { %630 = vmatpush3.bf16.msra.mxu0 %v629_v7  ;;  %v136_v32 = vld [vmem:[%s1028_s3 + $0x48] sm:$0xff]  ;;  %v641_v33 = vpack.c.bf16 %v44_v29, %v43_v28  ;;  %v45_v34 = vld [vmem:[%s1027_s1 + $0x60] sm:$0xff]  ;;  %v137_v37 = vld [vmem:[%s1028_s3 + $0x50] sm:$0xff] }
   0x9   :  { %631 = vmatprep.subr.bf16.mxu0 %v724_v0  ;;  %v46_v35 = vld [vmem:[%s1027_s1 + $0x68] sm:$0xff]  ;;  %v662_v36 = vpack.c.bf16 %v136_v32, %v135_v31  ;;  %v138_v38 = vld [vmem:[%s1028_s3 + $0x58] sm:$0xff]  ;;  %v47_v40 = vld [vmem:[%s1027_s1 + $0x70] sm:$0xff] }
   0xa   :  { %654 = vmatpush3.bf16.msra.mxu1 %v653_v18  ;;  %v644_v39 = vpack.c.bf16 %v46_v35, %v45_v34  ;;  %v48_v41 = vld [vmem:[%s1027_s1 + $0x78] sm:$0xff]  ;;  %v665_v42 = vpack.c.bf16 %v138_v38, %v137_v37  ;;  %v139_v43 = vld [vmem:[%s1028_s3 + $0x60] sm:$0xff]  ;;  %v140_v44 = vld [vmem:[%s1028_s3 + $0x68] sm:$0xff] }
   0xb   :  { %655 = vmatprep.subr.bf16.mxu1 %v724_v0  ;;  %v647_v45 = vpack.c.bf16 %v48_v41, %v47_v40  ;;  %v668_v46 = vpack.c.bf16 %v140_v44, %v139_v43  ;;  %v32_v47 = vld [vmem:[%s1029_s0] sm:$0xff]  ;;  %v141_v48 = vld [vmem:[%s1028_s3 + $0x70] sm:$0xff]  ;;  %v142_v49 = vld [vmem:[%s1028_s3 + $0x78] sm:$0xff] }
   0xc   :  { %633 = vmatpush3.bf16.msra.mxu0 %v632_v14  ;;  %v671_v50 = vpack.c.bf16 %v142_v49, %v141_v48  ;;  %v221_v51 = vld [vmem:[%s1030_s5] sm:$0xff]  ;;  %v222_v52 = vld [vmem:[%s1030_s5 + $0x8] sm:$0xff]  ;;  %v223_v53 = vld [vmem:[%s1030_s5 + $0x10] sm:$0xff] }
   0xd   :  { %634 = vmatprep.subr.bf16.mxu0 %v724_v0  ;;  %v674_v54 = vpack.c.bf16 %v222_v52, %v221_v51  ;;  %v224_v55 = vld [vmem:[%s1030_s5 + $0x18] sm:$0xff]  ;;  %v225_v57 = vld [vmem:[%s1030_s5 + $0x20] sm:$0xff]  ;;  %v226_v58 = vld [vmem:[%s1030_s5 + $0x28] sm:$0xff] }
   0xe   :  { %657 = vmatpush3.bf16.msra.mxu1 %v656_v24  ;;  %v677_v56 = vpack.c.bf16 %v224_v55, %v223_v53  ;;  %v680_v59 = vpack.c.bf16 %v226_v58, %v225_v57  ;;  %v227_v60 = vld [vmem:[%s1030_s5 + $0x30] sm:$0xff]  ;;  %v228_v61 = vld [vmem:[%s1030_s5 + $0x38] sm:$0xff]  ;;  %v229_v63 = vld [vmem:[%s1030_s5 + $0x40] sm:$0xff] }
   0xf   :  { %658 = vmatprep.subr.bf16.mxu1 %v724_v0  ;;  %v683_v62 = vpack.c.bf16 %v228_v61, %v227_v60  ;;  %v230_v1 = vld [vmem:[%s1030_s5 + $0x48] sm:$0xff]  ;;  %v231_v3 = vld [vmem:[%s1030_s5 + $0x50] sm:$0xff]  ;;  %v232_v5 = vld [vmem:[%s1030_s5 + $0x58] sm:$0xff] }
  0x10   :  { %636 = vmatpush3.bf16.msra.mxu0 %v635_v21  ;;  %v686_v2 = vpack.c.bf16 %v230_v1, %v229_v63  ;;  %v689_v6 = vpack.c.bf16 %v232_v5, %v231_v3  ;;  %v233_v7 = vld [vmem:[%s1030_s5 + $0x60] sm:$0xff]  ;;  %v234_v8 = vld [vmem:[%s1030_s5 + $0x68] sm:$0xff]  ;;  %v235_v15 = vld [vmem:[%s1030_s5 + $0x70] sm:$0xff] }
  0x11   :  { %637 = vmatprep.subr.bf16.mxu0 %v724_v0  ;;  %v692_v9 = vpack.c.bf16 %v234_v8, %v233_v7  ;;  %v413_v10 = vld [vmem:[%s1031_s2] ss:$0 sm:$0xff]  ;;  %v236_v16 = vld [vmem:[%s1030_s5 + $0x78] sm:$0xff]  ;;  %v316_v19 = vld [vmem:[%s1032_s7 + $0x8] sm:$0xff] }
  0x12   :  { %660 = vmatpush3.bf16.msra.mxu1 %v659_v30  ;;  %v695_v17 = vpack.c.bf16 %v236_v16, %v235_v15  ;;  %v315_v18 = vld [vmem:[%s1032_s7] sm:$0xff]  ;;  %v318_v21 = vld [vmem:[%s1032_s7 + $0x18] sm:$0xff]  ;;  %v320_v24 = vld [vmem:[%s1032_s7 + $0x28] sm:$0xff] }
  0x13   :  { %661 = vmatprep.subr.bf16.mxu1 %v724_v0  ;;  %v698_v20 = vpack.c.bf16 %v316_v19, %v315_v18  ;;  %v319_v23 = vld [vmem:[%s1032_s7 + $0x20] sm:$0xff]  ;;  %v321_v26 = vld [vmem:[%s1032_s7 + $0x30] sm:$0xff]  ;;  %v324_v30 = vld [vmem:[%s1032_s7 + $0x48] sm:$0xff] }
  0x14   :  { %639 = vmatpush3.bf16.msra.mxu0 %v638_v27  ;;  %v704_v25 = vpack.c.bf16 %v320_v24, %v319_v23  ;;  %v322_v27 = vld [vmem:[%s1032_s7 + $0x38] sm:$0xff]  ;;  %v323_v29 = vld [vmem:[%s1032_s7 + $0x40] sm:$0xff]  ;;  %v325_v32 = vld [vmem:[%s1032_s7 + $0x50] sm:$0xff] }
  0x15   :  { %640 = vmatprep.subr.bf16.mxu0 %v724_v0  ;;  %v707_v28 = vpack.c.bf16 %v322_v27, %v321_v26  ;;  %v710_v31 = vpack.c.bf16 %v324_v30, %v323_v29  ;;  %v327_v35 = vld [vmem:[%s1032_s7 + $0x60] sm:$0xff]  ;;  %v329_v43 = vld [vmem:[%s1032_s7 + $0x70] sm:$0xff]  ;;  %v330_v44 = vld [vmem:[%s1032_s7 + $0x78] sm:$0xff] }
  0x16   :  { %663 = vmatpush3.bf16.msra.mxu1 %v662_v36  ;;  %v328_v36 = vld [vmem:[%s1032_s7 + $0x68] sm:$0xff]  ;;  %v414_v38 = vld [vmem:[%s1033_s4] ss:$0 sm:$0xff] }
  0x17   :  { %664 = vmatprep.subr.bf16.mxu1 %v724_v0  ;;  %v716_v37 = vpack.c.bf16 %v328_v36, %v327_v35 }
  0x18   :  { %642 = vmatpush3.bf16.msra.mxu0 %v641_v33  ;;  %v326_v33 = vld [vmem:[%s1032_s7 + $0x58] sm:$0xff] }
  0x19   :  { %643 = vmatprep.subr.bf16.mxu0 %v724_v0  ;;  %v713_v34 = vpack.c.bf16 %v326_v33, %v325_v32 }
  0x1a   :  { %666 = vmatpush3.bf16.msra.mxu1 %v665_v42 }
  0x1b   :  { %667 = vmatprep.subr.bf16.mxu1 %v724_v0 }
  0x1c   :  { %645 = vmatpush3.bf16.msra.mxu0 %v644_v39 }
  0x1d   :  { %646 = vmatprep.subr.bf16.mxu0 %v724_v0 }
  0x1e   :  { %669 = vmatpush3.bf16.msra.mxu1 %v668_v46 }
  0x1f   :  { %670 = vmatprep.subr.bf16.mxu1 %v724_v0 }
  0x20   :  { %648 = vmatpush3.bf16.msra.mxu0 %v647_v45  ;;  %v719_v45 = vpack.c.bf16 %v330_v44, %v329_v43 }
  0x21   :  { %673 = vmatprep.subr.bf16.mxu0 %v724_v0 }
  0x22   :  { %672 = vmatpush3.bf16.msra.mxu1 %v671_v50  ;;  %v416_v50 = vld [vmem:[%s1035_s8] ss:$0 sm:$0xff] }
  0x23   :  { %518 = vmatmul.mubr.f32.vlgmr.msra.gmra.mrb[0].mxu0 %v32_v47  ;;  %697 = vmatprep.subr.bf16.mxu1 %v724_v0 }
  0x24   :  { %587 = vmatprep.mubr.msk.f32.mxu0 %vm725_vm0, %v726_v4  ;;  %675 = vmatpush3.bf16.msra.mxu0 %v674_v54 }
  0x25   :  { %676 = vmatprep.subr.bf16.mxu0 %v724_v0 }
  0x28   :  { %678 = vmatpush3.bf16.msra.mxu0 %v677_v56 }
  0x29   :  { %679 = vmatprep.subr.bf16.mxu0 %v724_v0 }
  0x2c   :  { %681 = vmatpush3.bf16.msra.mxu0 %v680_v59 }
  0x2d   :  { %682 = vmatprep.subr.bf16.mxu0 %v724_v0 }
  0x30   :  { %684 = vmatpush3.bf16.msra.mxu0 %v683_v62 }
  0x31   :  { %685 = vmatprep.subr.bf16.mxu0 %v724_v0 }
  0x34   :  { %687 = vmatpush3.bf16.msra.mxu0 %v686_v2 }
  0x35   :  { %688 = vmatprep.subr.bf16.mxu0 %v724_v0 }
  0x38   :  { %690 = vmatpush3.bf16.msra.mxu0 %v689_v6 }
  0x39   :  { %691 = vmatprep.subr.bf16.mxu0 %v724_v0 }
  0x3c   :  { %693 = vmatpush3.bf16.msra.mxu0 %v692_v9 }
  0x3d   :  { %694 = vmatprep.subr.bf16.mxu0 %v724_v0 }
  0x40   :  { %696 = vmatpush3.bf16.msra.mxu0 %v695_v17 }
  0xf6   :  { %v122_v11 = vpop.f32.mrb[0].mxu0 }
  0xf7   :  { %v123_v12 = vadd.f32 %v413_v10, %v122_v11  ;;  %v519_v13 = vpop.f32.mrb[1].mxu0 }
  0xf9   :  { %v126_v14 = vmax.f32 %v123_v12, 0.0 }
  0xfb   :  { %553 = vmatmul.mubr.f32.vlgmr.msra.gmra.mrb[0].mxu1 %v126_v14 }
  0xfc   :  { %622 = vmatprep.mubr.msk.f32.mxu1 %vm725_vm0, %v726_v4  ;;  %v317_v4 = vld [vmem:[%s1032_s7 + $0x10] sm:$0xff]  ;;  %699 = vmatpush3.bf16.msra.mxu1 %v698_v20 }
  0xfd   :  { %v701_v22 = vpack.c.bf16 %v318_v21, %v317_v4  ;;  %700 = vmatprep.subr.bf16.mxu1 %v724_v0 }
 0x100   :  { %702 = vmatpush3.bf16.msra.mxu1 %v701_v22 }
 0x101   :  { %703 = vmatprep.subr.bf16.mxu1 %v724_v0 }
 0x104   :  { %705 = vmatpush3.bf16.msra.mxu1 %v704_v25 }
 0x105   :  { %706 = vmatprep.subr.bf16.mxu1 %v724_v0 }
 0x108   :  { %708 = vmatpush3.bf16.msra.mxu1 %v707_v28 }
 0x109   :  { %709 = vmatprep.subr.bf16.mxu1 %v724_v0 }
 0x10c   :  { %711 = vmatpush3.bf16.msra.mxu1 %v710_v31 }
 0x10d   :  { %712 = vmatprep.subr.bf16.mxu1 %v724_v0 }
 0x110   :  { %714 = vmatpush3.bf16.msra.mxu1 %v713_v34 }
 0x111   :  { %715 = vmatprep.subr.bf16.mxu1 %v724_v0 }
 0x114   :  { %717 = vmatpush3.bf16.msra.mxu1 %v716_v37 }
 0x115   :  { %718 = vmatprep.subr.bf16.mxu1 %v724_v0  ;;  %v415_v0 = vld [vmem:[%s1034_s6] ss:$0 sm:$0xff] }
 0x118   :  { %720 = vmatpush3.bf16.msra.mxu1 %v719_v45 }
 0x1ce   :  { %v216_v39 = vpop.f32.mrb[0].mxu1 }
 0x1cf   :  { %v217_v40 = vadd.f32 %v414_v38, %v216_v39  ;;  %v554_v41 = vpop.f32.mrb[1].mxu1 }
 0x1d1   :  { %v220_v42 = vmax.f32 %v217_v40, 0.0 }
 0x1d3   :  { %588 = vmatmul.mubr.f32.vlgmr.msra.gmra.mrb[2].mxu0 %v220_v42 }
 0x2a6   :  { %v310_v46 = vpop.f32.mrb[2].mxu0 }
 0x2a7   :  { %v311_v47 = vadd.f32 %v415_v0, %v310_v46  ;;  %v589_v48 = vpop.f32.mrb[3].mxu0 }
 0x2a9   :  { %v314_v49 = vmax.f32 %v311_v47, 0.0 }
 0x2ab   :  { %623 = vmatmul.mubr.f32.vlgmr.msra.gmra.mrb[2].mxu1 %v314_v49 }
 0x37e   :  { %v404_v51 = vpop.f32.mrb[2].mxu1 }
 0x37f   :  { %v405_v52 = vadd.f32 %v416_v50, %v404_v51  ;;  %v624_v53 = vpop.f32.mrb[3].mxu1 }
 0x381   :  { %408 = vst [vmem:[%s1036_s9] sm:$0xff] %v405_v52 }

</bundles_post_ra>
